<compile_context>
chip_gen: v7x
topology: tpu7x:2x2x1
jax: 0.10.0
libtpu: 0.0.40
codegen_flags: <defaults>
</compile_context>

<pallas_src>
import jax
import jax.numpy as jnp
from jax.experimental import pallas as pl
from jax.experimental.pallas import tpu as pltpu

H1, H2 = 400, 300      # logical hidden widths (PyTorch spec)
H1P, H2P = 512, 384    # zero-padded to multiples of 128 (lane / MXU alignment)


def _round_up(x, m):
    return ((x + m - 1) // m) * m


def _critic_kernel(s_ref, a_ref, w1s_ref, w1a_ref, b1_ref, w2_ref, b2_ref,
                   w3_ref, b3_ref, o_ref):
    # Layer 1: split matmul replaces cat([state, action], 1) @ W1.
    h1 = jnp.dot(s_ref[...], w1s_ref[...], preferred_element_type=jnp.float32)
    h1 = h1 + jnp.dot(a_ref[...], w1a_ref[...], preferred_element_type=jnp.float32)
    h1 = jnp.maximum(h1 + b1_ref[...], 0.0)
    # Layer 2.
    h2 = jnp.dot(h1, w2_ref[...], preferred_element_type=jnp.float32)
    h2 = jnp.maximum(h2 + b2_ref[...], 0.0)
    # Layer 3 (N=1): VPU multiply + lane reduction (skips the MXU), then a
    # lane-dense (1, TB) store instead of TB masked single-lane stores.
    q = jnp.sum(h2 * w3_ref[...], axis=-1, keepdims=True) + b3_ref[...]   # (TB, 1)
    o_ref[...] = jnp.transpose(q).astype(o_ref.dtype)                     # (1, TB)


def critic_forward(state, action, packed_params, *, block_b=None):
    """Pallas-backed Critic.forward(state, action) using packed/padded params."""
    w1s, w1a, b1, w2, b2, w3, b3 = packed_params
    B, sd = state.shape
    ad = action.shape[1]

    # Batch tile: multiple of 8 sublanes, capped at 1024 rows (v7x VMEM headroom).
    if block_b is None:
        block_b = B if B <= 1024 else 1024
    block_b = min(_round_up(max(block_b, 8), 8), 1024)

    b_pad = _round_up(B, block_b)
    if b_pad != B:
        state = jnp.pad(state, ((0, b_pad - B), (0, 0)))
        action = jnp.pad(action, ((0, b_pad - B), (0, 0)))
    num_blocks = b_pad // block_b

    batch_tile = lambda i: (i, 0)     # pipelined batch tiles
    resident = lambda i: (0, 0)       # weights/biases stay VMEM-resident

    flops = 2 * b_pad * (sd * H1P + ad * H1P + H1P * H2P + H2P)
    weight_elems = (w1s.size + w1a.size + b1.size + w2.size + b2.size
                    + w3.size + b3.size)
    bytes_accessed = 4 * (b_pad * (sd + ad) + b_pad + weight_elems)

    out = pl.pallas_call(
        _critic_kernel,
        out_shape=jax.ShapeDtypeStruct((num_blocks, block_b), jnp.float32),
        grid=(num_blocks,),
        in_specs=[
            pl.BlockSpec((block_b, sd), batch_tile),   # state tile
            pl.BlockSpec((block_b, ad), batch_tile),   # action tile
            pl.BlockSpec((sd, H1P), resident),         # W1[:sd]   (state half)
            pl.BlockSpec((ad, H1P), resident),         # W1[sd:]   (action half)
            pl.BlockSpec((1, H1P), resident),          # b1
            pl.BlockSpec((H1P, H2P), resident),        # W2
            pl.BlockSpec((1, H2P), resident),          # b2
            pl.BlockSpec((1, H2P), resident),          # W3 as a row vector
            pl.BlockSpec((1, 1), resident),            # b3
        ],
        out_specs=pl.BlockSpec((1, block_b), batch_tile),
        compiler_params=pltpu.CompilerParams(
            dimension_semantics=("parallel",),
            vmem_limit_bytes=32 * 1024 * 1024,
        ),
        cost_estimate=pl.CostEstimate(
            flops=flops, transcendentals=0, bytes_accessed=bytes_accessed),
    )(state, action, w1s, w1a, b1, w2, b2, w3, b3)

    return out.reshape(b_pad, 1)[:B]


def init_critic_params(key, state_dim, action_dim):
    """PyTorch nn.Linear default init (U[-1/sqrt(fan_in), +1/sqrt(fan_in)]).
    Weights stored transposed: (in_features, out_features)."""
    dims = [(state_dim + action_dim, H1), (H1, H2), (H2, 1)]
    params = []
    for fan_in, fan_out in dims:
        key, kw, kb = jax.random.split(key, 3)
        bound = 1.0 / float(fan_in) ** 0.5
        w = jax.random.uniform(kw, (fan_in, fan_out), jnp.float32, -bound, bound)
        b = jax.random.uniform(kb, (1, fan_out), jnp.float32, -bound, bound)
        params += [w, b]
    return tuple(params)


def pack_critic_params(params, state_dim):
    """Split W1 into state/action halves and zero-pad hidden dims to
    lane-aligned widths (400->512, 300->384). Exact: padded hidden units are
    relu(0*x + 0) = 0 and their outgoing weights are 0."""
    w1, b1, w2, b2, w3, b3 = params
    w1s = jnp.pad(w1[:state_dim], ((0, 0), (0, H1P - H1)))
    w1a = jnp.pad(w1[state_dim:], ((0, 0), (0, H1P - H1)))
    b1p = jnp.pad(b1, ((0, 0), (0, H1P - H1)))
    w2p = jnp.pad(w2, ((0, H1P - H1), (0, H2P - H2)))
    b2p = jnp.pad(b2, ((0, 0), (0, H2P - H2)))
    w3p = jnp.pad(w3.T, ((0, 0), (0, H2P - H2)))   # (1, H2P) row vector
    b3p = b3.reshape(1, 1)
    return (w1s, w1a, b1p, w2p, b2p, w3p, b3p)


def _reference_forward(state, action, params):
    """Plain-JAX reference of the PyTorch forward (unpadded params)."""
    w1, b1, w2, b2, w3, b3 = params
    x = jnp.concatenate([state, action], axis=1)
    h1 = jnp.maximum(x @ w1 + b1, 0.0)
    h2 = jnp.maximum(h1 @ w2 + b2, 0.0)
    return h2 @ w3 + b3


if __name__ == "__main__":
    key = jax.random.PRNGKey(0)
    k_params, k_state, k_action = jax.random.split(key, 3)

    batch, state_dim, action_dim = 8, 16, 8
    params = init_critic_params(k_params, state_dim, action_dim)
    packed = pack_critic_params(params, state_dim)
    state = jax.random.normal(k_state, (batch, state_dim), jnp.float32)
    action = jax.random.normal(k_action, (batch, action_dim), jnp.float32)

    q = critic_forward(state, action, packed)
    jax.block_until_ready(q)

    q_ref = _reference_forward(state, action, params)
    assert q.shape == (batch, 1), q.shape
    assert jnp.allclose(q, q_ref, atol=1e-4, rtol=1e-4), float(
        jnp.max(jnp.abs(q - q_ref)))

    print("KERNEL_OK")
</pallas_src>

<mosaic_0001>
module attributes {stable_mosaic.version = 11 : i64} {
  func.func @_critic_kernel(%arg0: i32, %arg1: memref<8x16xf32, #tpu.memory_space<vmem>>, %arg2: memref<8x8xf32, #tpu.memory_space<vmem>>, %arg3: memref<16x512xf32, #tpu.memory_space<vmem>>, %arg4: memref<8x512xf32, #tpu.memory_space<vmem>>, %arg5: memref<1x512xf32, #tpu.memory_space<vmem>>, %arg6: memref<512x384xf32, #tpu.memory_space<vmem>>, %arg7: memref<1x384xf32, #tpu.memory_space<vmem>>, %arg8: memref<1x384xf32, #tpu.memory_space<vmem>>, %arg9: memref<1x1xf32, #tpu.memory_space<vmem>>, %arg10: memref<1x8xf32, #tpu.memory_space<vmem>>) attributes {dimension_semantics = [#tpu.dimension_semantics<parallel>], iteration_bounds = array<i64: 1>, scalar_prefetch = 0 : i64, scratch_operands = 0 : i64, tpu.core_type = #tpu.core_type<tc>, window_params = [{transform_indices = @transform_0, window_bounds = array<i64: 8, 16>}, {transform_indices = @transform_1, window_bounds = array<i64: 8, 8>}, {pipeline_mode = #tpu.pipeline_mode<synchronous>, transform_indices = @transform_2, window_bounds = array<i64: 16, 512>}, {pipeline_mode = #tpu.pipeline_mode<synchronous>, transform_indices = @transform_3, window_bounds = array<i64: 8, 512>}, {pipeline_mode = #tpu.pipeline_mode<synchronous>, transform_indices = @transform_4, window_bounds = array<i64: 1, 512>}, {pipeline_mode = #tpu.pipeline_mode<synchronous>, transform_indices = @transform_5, window_bounds = array<i64: 512, 384>}, {pipeline_mode = #tpu.pipeline_mode<synchronous>, transform_indices = @transform_6, window_bounds = array<i64: 1, 384>}, {pipeline_mode = #tpu.pipeline_mode<synchronous>, transform_indices = @transform_7, window_bounds = array<i64: 1, 384>}, {pipeline_mode = #tpu.pipeline_mode<synchronous>, transform_indices = @transform_8, window_bounds = array<i64: 1, 1>}, {transform_indices = @transform_9, window_bounds = array<i64: 1, 8>}]} {
    %c0 = arith.constant 0 : index
    %c0_0 = arith.constant 0 : index
    %0 = vector.load %arg1[%c0, %c0_0] : memref<8x16xf32, #tpu.memory_space<vmem>>, vector<8x16xf32>
    %c0_1 = arith.constant 0 : index
    %c0_2 = arith.constant 0 : index
    %1 = vector.load %arg3[%c0_1, %c0_2] : memref<16x512xf32, #tpu.memory_space<vmem>>, vector<16x512xf32>
    %cst = arith.constant dense<0.000000e+00> : vector<8x512xf32>
    %2 = tpu.matmul %0, %1, %cst {dimension_numbers = #tpu.dot_dimension_numbers<[1], [0], [0], [1], [0, 0, 1, 1], [], []>} : vector<8x16xf32>, vector<16x512xf32>, vector<8x512xf32> -> vector<8x512xf32>
    %c0_3 = arith.constant 0 : index
    %c0_4 = arith.constant 0 : index
    %3 = vector.load %arg2[%c0_3, %c0_4] : memref<8x8xf32, #tpu.memory_space<vmem>>, vector<8x8xf32>
    %c0_5 = arith.constant 0 : index
    %c0_6 = arith.constant 0 : index
    %4 = vector.load %arg4[%c0_5, %c0_6] : memref<8x512xf32, #tpu.memory_space<vmem>>, vector<8x512xf32>
    %cst_7 = arith.constant dense<0.000000e+00> : vector<8x512xf32>
    %5 = tpu.matmul %3, %4, %cst_7 {dimension_numbers = #tpu.dot_dimension_numbers<[1], [0], [0], [1], [0, 0, 1, 1], [], []>} : vector<8x8xf32>, vector<8x512xf32>, vector<8x512xf32> -> vector<8x512xf32>
    %6 = arith.addf %2, %5 : vector<8x512xf32>
    %c0_8 = arith.constant 0 : index
    %c0_9 = arith.constant 0 : index
    %7 = vector.load %arg5[%c0_8, %c0_9] : memref<1x512xf32, #tpu.memory_space<vmem>>, vector<1x512xf32>
    %8 = vector.broadcast %7 : vector<1x512xf32> to vector<8x512xf32>
    %9 = arith.addf %6, %8 : vector<8x512xf32>
    %cst_10 = arith.constant 0.000000e+00 : f32
    %10 = vector.broadcast %cst_10 : f32 to vector<8x512xf32>
    %11 = arith.maximumf %9, %10 : vector<8x512xf32>
    %c0_11 = arith.constant 0 : index
    %c0_12 = arith.constant 0 : index
    %12 = vector.load %arg6[%c0_11, %c0_12] : memref<512x384xf32, #tpu.memory_space<vmem>>, vector<512x384xf32>
    %cst_13 = arith.constant dense<0.000000e+00> : vector<8x384xf32>
    %13 = tpu.matmul %11, %12, %cst_13 {dimension_numbers = #tpu.dot_dimension_numbers<[1], [0], [0], [1], [0, 0, 1, 1], [], []>} : vector<8x512xf32>, vector<512x384xf32>, vector<8x384xf32> -> vector<8x384xf32>
    %c0_14 = arith.constant 0 : index
    %c0_15 = arith.constant 0 : index
    %14 = vector.load %arg7[%c0_14, %c0_15] : memref<1x384xf32, #tpu.memory_space<vmem>>, vector<1x384xf32>
    %15 = vector.broadcast %14 : vector<1x384xf32> to vector<8x384xf32>
    %16 = arith.addf %13, %15 : vector<8x384xf32>
    %cst_16 = arith.constant 0.000000e+00 : f32
    %17 = vector.broadcast %cst_16 : f32 to vector<8x384xf32>
    %18 = arith.maximumf %16, %17 : vector<8x384xf32>
    %c0_17 = arith.constant 0 : index
    %c0_18 = arith.constant 0 : index
    %19 = vector.load %arg8[%c0_17, %c0_18] : memref<1x384xf32, #tpu.memory_space<vmem>>, vector<1x384xf32>
    %20 = vector.broadcast %19 : vector<1x384xf32> to vector<8x384xf32>
    %21 = arith.mulf %18, %20 : vector<8x384xf32>
    %cst_19 = arith.constant dense<0.000000e+00> : vector<8xf32>
    %22 = vector.multi_reduction <add>, %21, %cst_19 [1] : vector<8x384xf32> to vector<8xf32>
    %23 = vector.shape_cast %22 : vector<8xf32> to vector<8x1xf32>
    %c0_20 = arith.constant 0 : index
    %c0_21 = arith.constant 0 : index
    %24 = vector.load %arg9[%c0_20, %c0_21] : memref<1x1xf32, #tpu.memory_space<vmem>>, vector<1x1xf32>
    %25 = vector.broadcast %24 : vector<1x1xf32> to vector<8x1xf32>
    %26 = arith.addf %23, %25 : vector<8x1xf32>
    %27 = tpu.transpose %26, [1, 0] : vector<8x1xf32> -> vector<1x8xf32>
    %c0_22 = arith.constant 0 : index
    %c0_23 = arith.constant 0 : index
    %28 = vector.load %arg10[%c0_22, %c0_23] : memref<1x8xf32, #tpu.memory_space<vmem>>, vector<1x8xf32>
    tpu.vector_store %arg10[%c0_22, %c0_23], %27 {strides = array<i32>} : memref<1x8xf32, #tpu.memory_space<vmem>>, vector<1x8xf32>,
    return
  }
  func.func @transform_0(%arg0: i32) -> (i32, i32) {
    %c0_i32 = arith.constant 0 : i32
    %c0_i32_0 = arith.constant 0 : i32
    return %arg0, %c0_i32 : i32, i32
  }
  func.func @transform_1(%arg0: i32) -> (i32, i32) {
    %c0_i32 = arith.constant 0 : i32
    %c0_i32_0 = arith.constant 0 : i32
    return %arg0, %c0_i32 : i32, i32
  }
  func.func @transform_2(%arg0: i32) -> (i32, i32) {
    %c0_i32 = arith.constant 0 : i32
    %c0_i32_0 = arith.constant 0 : i32
    %c0_i32_1 = arith.constant 0 : i32
    return %c0_i32, %c0_i32_0 : i32, i32
  }
  func.func @transform_3(%arg0: i32) -> (i32, i32) {
    %c0_i32 = arith.constant 0 : i32
    %c0_i32_0 = arith.constant 0 : i32
    %c0_i32_1 = arith.constant 0 : i32
    return %c0_i32, %c0_i32_0 : i32, i32
  }
  func.func @transform_4(%arg0: i32) -> (i32, i32) {
    %c0_i32 = arith.constant 0 : i32
    %c0_i32_0 = arith.constant 0 : i32
    %c0_i32_1 = arith.constant 0 : i32
    return %c0_i32, %c0_i32_0 : i32, i32
  }
  func.func @transform_5(%arg0: i32) -> (i32, i32) {
    %c0_i32 = arith.constant 0 : i32
    %c0_i32_0 = arith.constant 0 : i32
    %c0_i32_1 = arith.constant 0 : i32
    return %c0_i32, %c0_i32_0 : i32, i32
  }
  func.func @transform_6(%arg0: i32) -> (i32, i32) {
    %c0_i32 = arith.constant 0 : i32
    %c0_i32_0 = arith.constant 0 : i32
    %c0_i32_1 = arith.constant 0 : i32
    return %c0_i32, %c0_i32_0 : i32, i32
  }
  func.func @transform_7(%arg0: i32) -> (i32, i32) {
    %c0_i32 = arith.constant 0 : i32
    %c0_i32_0 = arith.constant 0 : i32
    %c0_i32_1 = arith.constant 0 : i32
    return %c0_i32, %c0_i32_0 : i32, i32
  }
  func.func @transform_8(%arg0: i32) -> (i32, i32) {
    %c0_i32 = arith.constant 0 : i32
    %c0_i32_0 = arith.constant 0 : i32
    %c0_i32_1 = arith.constant 0 : i32
    return %c0_i32, %c0_i32_0 : i32, i32
  }
  func.func @transform_9(%arg0: i32) -> (i32, i32) {
    %c0_i32 = arith.constant 0 : i32
    %c0_i32_0 = arith.constant 0 : i32
    return %arg0, %c0_i32 : i32, i32
  }
}

</mosaic_0001>

<bundles_post_ra>
// kernel: tpu_custom_call.1
= control target key start
LH: loop header
LB: loop body
LE: loop exit
PB: predicated region body
PF: predicated region fallthrough
CT: control target
= control target key end

     0   :  { %s1633_s0 = inlined_call_operand.hbm [shape: f32[8,16], index: 0, kind: input, shape index: {}]   ;;  %s1634_s1 = inlined_call_operand.hbm [shape: f32[8,8], index: 1, kind: input, shape index: {}]   ;;  %s1635_s2 = inlined_call_operand.hbm [shape: f32[16,512], index: 2, kind: input, shape index: {}]   ;;  %s1636_s3 = inlined_call_operand.hbm [shape: f32[8,512], index: 3, kind: input, shape index: {}]   ;;  %s1637_s4 = inlined_call_operand.vmem [shape: f32[1,512], index: 4, kind: input, shape index: {}]   ;;  %s1638_s5 = inlined_call_operand.hbm [shape: f32[512,384], index: 5, kind: input, shape index: {}]   ;;  %s1639_s6 = inlined_call_operand.vmem [shape: f32[1,384], index: 6, kind: input, shape index: {}]   ;;  %s1640_s7 = inlined_call_operand.vmem [shape: f32[1,384], index: 7, kind: input, shape index: {}]   ;;  %s1641_s8 = inlined_call_operand.<no memory space> [shape: f32[1,1], index: 8, kind: input, shape index: {}]   ;;  %s1642_s9 = inlined_call_operand.hbm [shape: f32[1,8], index: 9, kind: output, shape index: {}]  }
   0x1   :  { %v14_v0 = vstv %s1641_s8 }
   0x2   :  { %15 = vst [vmem:[#allocation2] sm:$0x1] %v14_v0 }
   0x3   :  { %16 = vsyncpa [#allocation4], 0 }
   0x4   :  { %17 = vsyncpa [#allocation7], 0 }
   0x5   :  { %18 = vsyncpa [#allocation10], 0 }
   0x6   :  { %19 = vsyncpa [#allocation5], 0  ;;  %s1444_s11 = smov [#allocation6]   ;;  %s1445_s13 = smov [#allocation9]  }
   0x7   :  { %s36_s12 = sshll.u32 %s1444_s11, 4  ;;  %s58_s14 = sshll.u32 %s1445_s13, 4  ;;  %s37_s12 = int_to_ptr.vmem [resolvable:$true] %s36_s12  ;;  %s59_s14 = int_to_ptr.vmem [resolvable:$true] %s58_s14 }
   0x8   :  { %s1304_s17 = scalar_lea.hbm %s1634_s1, 128 }
   0x9   :  { %p1305_p0 = scmp.ne.s32.totalorder %s1634_s1, %s1304_s17  ;;  %p1308_p1 = scmp.lt.u32.totalorder %s1304_s17, %s1634_s1 }
   0xb   :  { %p1310_p2 = pnand %p1308_p1, %p1305_p0 }
   0xd   :  { %1313 = shalt.err (!%p1310_p2)
}
   0xe   :  { %s1314_s21 = scalar_lea.vmem %s37_s12, 128  ;;  %p1319_p4 = scmp.lt.s32.totalorder %s37_s12, %s37_s12 }
   0xf   :  { %p1315_p3 = scmp.ne.s32.totalorder %s37_s12, %s1314_s21  ;;  %p1320_p5 = scmp.lt.s32.totalorder %s1314_s21, %s1314_s21 }
  0x11   :  { %p1321_p6 = por %p1320_p5, %p1319_p4 }
  0x13   :  { %p1322_p7 = pnand %p1321_p6, %p1315_p3 }
  0x15   :  { %1325 = shalt.err (!%p1322_p7)
}
  0x16   :  { %39 = dma.hbm_to_vmem [thread:$0]  %s1634_s1, 128, %s37_s12, [#allocation7]  }
  0x17   :  { %s1326_s26 = scalar_lea.hbm %s1636_s3, 512 }
  0x18   :  { %p1327_p8 = scmp.ne.s32.totalorder %s1636_s3, %s1326_s26  ;;  %p1330_p9 = scmp.lt.u32.totalorder %s1326_s26, %s1636_s3 }
  0x1a   :  { %p1332_p10 = pnand %p1330_p9, %p1327_p8 }
  0x1c   :  { %1335 = shalt.err (!%p1332_p10)
}
  0x1d   :  { %s1336_s10 = scalar_lea.vmem %s59_s14, 512  ;;  %p1341_p12 = scmp.lt.s32.totalorder %s59_s14, %s59_s14 }
  0x1e   :  { %p1337_p11 = scmp.ne.s32.totalorder %s59_s14, %s1336_s10  ;;  %p1342_p13 = scmp.lt.s32.totalorder %s1336_s10, %s1336_s10 }
  0x20   :  { %p1343_p0 = por %p1342_p13, %p1341_p12 }
  0x22   :  { %p1344_p1 = pnand %p1343_p0, %p1337_p11 }
  0x24   :  { %1347 = shalt.err (!%p1344_p1)
}
  0x25   :  { %61 = dma.hbm_to_vmem [thread:$0]  %s1636_s3, 512, %s59_s14, [#allocation10]  }
  0x26   :  { %s1446_s12 = smov [#allocation3]   ;;  %s1447_s15 = smov [#allocation8]  }
  0x27   :  { %s26_s13 = sshll.u32 %s1446_s12, 4  ;;  %s45_s16 = sshll.u32 %s1447_s15, 4  ;;  %s27_s13 = int_to_ptr.vmem [resolvable:$true] %s26_s13  ;;  %s1532_s16 = int_to_ptr.vmem [resolvable:$true] %s45_s16 }
  0x28   :  { %s1348_s19 = scalar_lea.hbm %s1633_s0, 128 }
  0x29   :  { %p1349_p2 = scmp.ne.s32.totalorder %s1633_s0, %s1348_s19  ;;  %p1352_p3 = scmp.lt.u32.totalorder %s1348_s19, %s1633_s0 }
  0x2b   :  { %p1354_p4 = pnand %p1352_p3, %p1349_p2 }
  0x2d   :  { %1357 = shalt.err (!%p1354_p4)
}
  0x2e   :  { %s1358_s3 = scalar_lea.vmem %s27_s13, 128  ;;  %p1363_p6 = scmp.lt.s32.totalorder %s27_s13, %s27_s13 }
  0x2f   :  { %p1359_p5 = scmp.ne.s32.totalorder %s27_s13, %s1358_s3  ;;  %p1364_p7 = scmp.lt.s32.totalorder %s1358_s3, %s1358_s3 }
  0x31   :  { %p1365_p8 = por %p1364_p7, %p1363_p6 }
  0x33   :  { %p1366_p9 = pnand %p1365_p8, %p1359_p5 }
  0x35   :  { %1369 = shalt.err (!%p1366_p9)
}
  0x36   :  { %29 = dma.hbm_to_vmem [thread:$0]  %s1633_s0, 128, %s27_s13, [#allocation4]  }
  0x37   :  { %s1370_s26 = scalar_lea.hbm %s1635_s2, 1024 }
  0x38   :  { %p1371_p10 = scmp.ne.s32.totalorder %s1635_s2, %s1370_s26  ;;  %p1374_p11 = scmp.lt.u32.totalorder %s1370_s26, %s1635_s2 }
  0x3a   :  { %p1376_p12 = pnand %p1374_p11, %p1371_p10 }
  0x3c   :  { %1379 = shalt.err (!%p1376_p12)
}
  0x3d   :  { %s1380_s10 = scalar_lea.vmem %s1532_s16, 1024  ;;  %p1385_p0 = scmp.lt.s32.totalorder %s1532_s16, %s1532_s16 }
  0x3e   :  { %p1381_p13 = scmp.ne.s32.totalorder %s1532_s16, %s1380_s10  ;;  %p1386_p1 = scmp.lt.s32.totalorder %s1380_s10, %s1380_s10 }
  0x40   :  { %p1387_p2 = por %p1386_p1, %p1385_p0 }
  0x42   :  { %p1388_p3 = pnand %p1387_p2, %p1381_p13 }
  0x44   :  { %1391 = shalt.err (!%p1388_p3)
}
  0x45   :  { %s1448_s0 = smov 512   ;;  %s1449_s1 = smov 32  }
  0x46   :  { %51 = dma.hbm_to_vmem [thread:$0]  %s1635_s2, 1024, %s1532_s16, [#allocation7], %s1448_s0, %s1448_s0, %s1449_s1  }
  0x47   :  { %s1450_s13 = smov [#allocation11]   ;;  %s1392_s19 = scalar_lea.hbm %s1638_s5, 24576 }
  0x48   :  { %s69_s15 = sshll.u32 %s1450_s13, 4  ;;  %p1393_p4 = scmp.ne.s32.totalorder %s1638_s5, %s1392_s19  ;;  %s70_s15 = int_to_ptr.vmem [resolvable:$true] %s69_s15 }
  0x49   :  { %p1396_p5 = scmp.lt.u32.totalorder %s1392_s19, %s1638_s5 }
  0x4b   :  { %p1398_p6 = pnand %p1396_p5, %p1393_p4 }
  0x4d   :  { %1401 = shalt.err (!%p1398_p6)
}
  0x4e   :  { %s1402_s3 = scalar_lea.vmem %s70_s15, 24576  ;;  %p1407_p8 = scmp.lt.s32.totalorder %s70_s15, %s70_s15 }
  0x4f   :  { %p1403_p7 = scmp.ne.s32.totalorder %s70_s15, %s1402_s3  ;;  %p1408_p9 = scmp.lt.s32.totalorder %s1402_s3, %s1402_s3 }
  0x51   :  { %p1409_p10 = por %p1408_p9, %p1407_p8 }
  0x53   :  { %p1410_p11 = pnand %p1409_p10, %p1403_p7 }
  0x55   :  { %1413 = shalt.err (!%p1410_p11)
}
  0x56   :  { %s1451_s2 = smov 384   ;;  %s1452_s16 = smov 24  }
  0x57   :  { %75 = dma.hbm_to_vmem [thread:$0]  %s1638_s5, 24576, %s70_s15, [#allocation10], %s1451_s2, %s1451_s2, %s1452_s16  }
  0x58   :  { %1436 = dma.done.wait [#allocation4], 128  }
  0x59   :  { %1437 = vsyncadd [#allocation4], 4294967168 }
  0x5a   :  { %1438 = dma.done.wait [#allocation7], 1152  }
  0x5b   :  { %1439 = vsyncadd [#allocation7], 4294966144 }
  0x5c   :  { %1440 = dma.done.wait [#allocation10], 25088  }
  0x5d   :  { %1441 = vsyncadd [#allocation10], 4294942208  ;;  %v1453_v1 = vmov 0.0   ;;  %v108_v2 = vld [vmem:[#allocation9 + $0x8] sm:$0xff]  ;;  %v107_v3 = vld [vmem:[#allocation9] sm:$0xff]  ;;  %vm111_vm0 = vcmask 64512  }
  0x5e   :  { %179 = vmatprep.mubr.f32.mxu1 %v1453_v1  ;;  %v106_v4 = vld [vmem:[#allocation6] sm:$0xff]  ;;  %115 = vmatprep.subr.mxu1 %v108_v2  ;;  %v109_v6 = vld [vmem:[#allocation9 + $0x10] sm:$0xff]  ;;  %v99_v7 = vld [vmem:[#allocation8 + $0x8] sm:$0xff]  ;;  %vm257_vm1 = vcmask 130048   ;;  %vm991_vm2 = vcmask 57344  }
  0x5f   :  { %v110_v5 = vld [vmem:[#allocation9 + $0x18] sm:$0xff]  ;;  %116 = vmatpush1.msra.mxu1 %v107_v3  ;;  %v103_v8 = vld [vmem:[#allocation8 + $0x28] sm:$0xff]  ;;  %v98_v9 = vld [vmem:[#allocation8] sm:$0xff] }
  0x60   :  { %v102_v10 = vld [vmem:[#allocation8 + $0x20] sm:$0xff]  ;;  %1010 = vmatmul.mubr.msk.f32.vlgmr.msra.gmra.mrb[0].mxu1 %vm111_vm0, %v106_v4  ;;  %186 = vmatprep.subr.mxu1 %v110_v5  ;;  %v1085_v11 = vpack.c.bf16 %v103_v8, %v99_v7  ;;  %v101_v12 = vld [vmem:[#allocation8 + $0x18] sm:$0xff]  ;;  %v100_v15 = vld [vmem:[#allocation8 + $0x10] sm:$0xff] }
  0x61   :  { %v105_v13 = vld [vmem:[#allocation8 + $0x38] sm:$0xff]  ;;  %187 = vmatpush1.msra.mxu1 %v109_v6  ;;  %250 = vmatprep.mubr.f32.mxu1 %v1453_v1  ;;  %v1087_v14 = vpack.c.bf16 %v102_v10, %v98_v9  ;;  %v104_v16 = vld [vmem:[#allocation8 + $0x30] sm:$0xff]  ;;  %v434_v17 = vld [vmem:[#allocation11 + $0x8] sm:$0xff] }
  0x62   :  { %1086 = vmatprep.subr.bf16.mxu1 %v1085_v11  ;;  %v1089_v18 = vpack.c.bf16 %v105_v13, %v101_v12  ;;  %v437_v19 = vld [vmem:[#allocation11 + $0x20] sm:$0xff]  ;;  %v436_v21 = vld [vmem:[#allocation11 + $0x18] sm:$0xff]  ;;  %v443_v25 = vld [vmem:[#allocation11 + $0x50] sm:$0xff]  ;;  %v1091_v30 = vpack.c.bf16 %v104_v16, %v100_v15 }
  0x63   :  { %v433_v20 = vld [vmem:[#allocation11] sm:$0xff]  ;;  %v1093_v22 = vpack.c.bf16 %v437_v19, %v434_v17  ;;  %v440_v24 = vld [vmem:[#allocation11 + $0x38] sm:$0xff]  ;;  %v439_v27 = vld [vmem:[#allocation11 + $0x30] sm:$0xff] }
  0x64   :  { %v1095_v23 = vpack.c.bf16 %v436_v21, %v433_v20  ;;  %1011 = vmatmul.mubr.msk.f32.vlgmr.msra.gmra.mrb[2].mxu1 %vm111_vm0, %v106_v4  ;;  %v1097_v26 = vpack.c.bf16 %v443_v25, %v440_v24  ;;  %v442_v28 = vld [vmem:[#allocation11 + $0x48] sm:$0xff]  ;;  %v97_v29 = vld [vmem:[#allocation3] sm:$0xff]  ;;  %v449_v32 = vld [vmem:[#allocation11 + $0x80] sm:$0xff] }
  0x65   :  { %1088 = vmatpush1.bf16.msra.mxu1 %v1087_v14  ;;  %325 = vmatprep.mubr.f32.mxu1 %v1453_v1  ;;  %v446_v31 = vld [vmem:[#allocation11 + $0x68] sm:$0xff]  ;;  %v1099_v33 = vpack.c.bf16 %v442_v28, %v439_v27  ;;  %v445_v35 = vld [vmem:[#allocation11 + $0x60] sm:$0xff]  ;;  %v448_v36 = vld [vmem:[#allocation11 + $0x78] sm:$0xff] }
  0x66   :  { %1090 = vmatprep.subr.bf16.mxu1 %v1089_v18  ;;  %1094 = vmatprep.subr.bf16.mxu0 %v1093_v22  ;;  %v1101_v34 = vpack.c.bf16 %v449_v32, %v446_v31  ;;  %v452_v37 = vld [vmem:[#allocation11 + $0x98] sm:$0xff]  ;;  %v455_v38 = vld [vmem:[#allocation11 + $0xb0] sm:$0xff]  ;;  %v1103_v39 = vpack.c.bf16 %v448_v36, %v445_v35  ;;  %v454_v42 = vld [vmem:[#allocation11 + $0xa8] sm:$0xff] }
  0x67   :  { %1096 = vmatpush1.bf16.msra.mxu0 %v1095_v23  ;;  %v1105_v40 = vpack.c.bf16 %v455_v38, %v452_v37  ;;  %v451_v41 = vld [vmem:[#allocation11 + $0x90] sm:$0xff]  ;;  %v458_v43 = vld [vmem:[#allocation11 + $0xc8] sm:$0xff]  ;;  %v461_v44 = vld [vmem:[#allocation11 + $0xe0] sm:$0xff] }
  0x68   :  { %1012 = vmatmul.mubr.msk.f32.vlgmr.msra.gmra.mrb[0].mxu1 %vm257_vm1, %v97_v29  ;;  %1098 = vmatprep.subr.bf16.mxu0 %v1097_v26  ;;  %v483_v45 = vld [vmem:[#allocation11 + $0x190] sm:$0xff]  ;;  %v486_v46 = vld [vmem:[#allocation11 + $0x1a8] sm:$0xff]  ;;  %v1107_v50 = vpack.c.bf16 %v454_v42, %v451_v41  ;;  %v457_v51 = vld [vmem:[#allocation11 + $0xc0] sm:$0xff]  ;;  %v1109_v54 = vpack.c.bf16 %v461_v44, %v458_v43 }
  0x69   :  { %1092 = vmatpush1.bf16.msra.mxu1 %v1091_v30  ;;  %396 = vmatprep.mubr.f32.mxu1 %v1453_v1  ;;  %v1221_v47 = vpack.c.bf16 %v486_v46, %v483_v45  ;;  %v435_v48 = vld [vmem:[#allocation11 + $0x10] sm:$0xff]  ;;  %v438_v49 = vld [vmem:[#allocation11 + $0x28] sm:$0xff]  ;;  %v489_v53 = vld [vmem:[#allocation11 + $0x1c0] sm:$0xff] }
  0x6a   :  { %v1223_v52 = vpack.c.bf16 %v438_v49, %v435_v48  ;;  %v460_v55 = vld [vmem:[#allocation11 + $0xd8] sm:$0xff]  ;;  %v467_v58 = vld [vmem:[#allocation11 + $0x110] sm:$0xff]  ;;  %v441_v60 = vld [vmem:[#allocation11 + $0x40] sm:$0xff] }
  0x6b   :  { %1100 = vmatpush1.bf16.msra.mxu0 %v1099_v33  ;;  %v464_v56 = vld [vmem:[#allocation11 + $0xf8] sm:$0xff]  ;;  %1222 = vmatprep.subr.bf16.mxu1 %v1221_v47  ;;  %v495_v63 = vld [vmem:[#allocation11 + $0x1f0] sm:$0xff]  ;;  %v498_v0 = vld [vmem:[#allocation11 + $0x208] sm:$0xff]  ;;  %v1111_v1 = vpack.c.bf16 %v460_v55, %v457_v51 }
  0x6c   :  { %1013 = vmatmul.mubr.msk.f32.vlgmr.msra.gmra.mrb[2].mxu1 %vm257_vm1, %v97_v29  ;;  %1102 = vmatprep.subr.bf16.mxu0 %v1101_v34  ;;  %v492_v57 = vld [vmem:[#allocation11 + $0x1d8] sm:$0xff]  ;;  %v463_v2 = vld [vmem:[#allocation11 + $0xf0] sm:$0xff]  ;;  %v1229_v3 = vpack.c.bf16 %v498_v0, %v495_v63  ;;  %v1113_v5 = vpack.c.bf16 %v467_v58, %v464_v56  ;;  %v466_v6 = vld [vmem:[#allocation11 + $0x108] sm:$0xff] }
  0x6d   :  { %1224 = vmatpush3.bf16.msra.mxu1 %v1223_v52  ;;  %v1225_v59 = vpack.c.bf16 %v492_v57, %v489_v53  ;;  %v444_v61 = vld [vmem:[#allocation11 + $0x58] sm:$0xff]  ;;  %v447_v4 = vld [vmem:[#allocation11 + $0x70] sm:$0xff]  ;;  %v470_v7 = vld [vmem:[#allocation11 + $0x128] sm:$0xff]  ;;  %v1115_v16 = vpack.c.bf16 %v466_v6, %v463_v2 }
  0x6e   :  { %v1227_v62 = vpack.c.bf16 %v444_v61, %v441_v60  ;;  %v450_v8 = vld [vmem:[#allocation11 + $0x88] sm:$0xff]  ;;  %v473_v9 = vld [vmem:[#allocation11 + $0x140] sm:$0xff]  ;;  %v504_v12 = vld [vmem:[#allocation11 + $0x238] sm:$0xff] }
  0x6f   :  { %1104 = vmatpush1.bf16.msra.mxu0 %v1103_v39  ;;  %1226 = vmatprep.subr.bf16.mxu1 %v1225_v59  ;;  %v1231_v10 = vpack.c.bf16 %v450_v8, %v447_v4  ;;  %v501_v11 = vld [vmem:[#allocation11 + $0x220] sm:$0xff]  ;;  %v456_v15 = vld [vmem:[#allocation11 + $0xb8] sm:$0xff]  ;;  %v507_v17 = vld [vmem:[#allocation11 + $0x250] sm:$0xff]  ;;  %v1117_v18 = vpack.c.bf16 %v473_v9, %v470_v7 }
  0x70   :  { %1106 = vmatprep.subr.bf16.mxu0 %v1105_v40  ;;  %v1233_v13 = vpack.c.bf16 %v504_v12, %v501_v11  ;;  %v453_v14 = vld [vmem:[#allocation11 + $0xa0] sm:$0xff]  ;;  %v472_v20 = vld [vmem:[#allocation11 + $0x138] sm:$0xff]  ;;  %v510_v21 = vld [vmem:[#allocation11 + $0x268] sm:$0xff] }
  0x71   :  { %1228 = vmatpush3.bf16.msra.mxu1 %v1227_v62  ;;  %v469_v19 = vld [vmem:[#allocation11 + $0x120] sm:$0xff]  ;;  %v476_v22 = vld [vmem:[#allocation11 + $0x158] sm:$0xff]  ;;  %v479_v23 = vld [vmem:[#allocation11 + $0x170] sm:$0xff]  ;;  %v1235_v24 = vpack.c.bf16 %v456_v15, %v453_v14  ;;  %v1237_v25 = vpack.c.bf16 %v510_v21, %v507_v17 }
  0x72   :  { %1230 = vmatprep.subr.bf16.mxu1 %v1229_v3  ;;  %v459_v26 = vld [vmem:[#allocation11 + $0xd0] sm:$0xff]  ;;  %v462_v27 = vld [vmem:[#allocation11 + $0xe8] sm:$0xff]  ;;  %v1119_v28 = vpack.c.bf16 %v472_v20, %v469_v19  ;;  %v513_v29 = vld [vmem:[#allocation11 + $0x280] sm:$0xff]  ;;  %v1121_v31 = vpack.c.bf16 %v479_v23, %v476_v22 }
  0x73   :  { %1108 = vmatpush1.bf16.msra.mxu0 %v1107_v50  ;;  %v516_v30 = vld [vmem:[#allocation11 + $0x298] sm:$0xff]  ;;  %v475_v32 = vld [vmem:[#allocation11 + $0x150] sm:$0xff]  ;;  %v478_v33 = vld [vmem:[#allocation11 + $0x168] sm:$0xff]  ;;  %v1239_v36 = vpack.c.bf16 %v462_v27, %v459_v26 }
  0x74   :  { %1110 = vmatprep.subr.bf16.mxu0 %v1109_v54  ;;  %v482_v34 = vld [vmem:[#allocation11 + $0x188] sm:$0xff]  ;;  %v485_v35 = vld [vmem:[#allocation11 + $0x1a0] sm:$0xff]  ;;  %v1241_v37 = vpack.c.bf16 %v516_v30, %v513_v29  ;;  %v468_v39 = vld [vmem:[#allocation11 + $0x118] sm:$0xff]  ;;  %v1123_v40 = vpack.c.bf16 %v478_v33, %v475_v32 }
  0x75   :  { %1232 = vmatpush3.bf16.msra.mxu1 %v1231_v10  ;;  %v465_v38 = vld [vmem:[#allocation11 + $0x100] sm:$0xff]  ;;  %v519_v41 = vld [vmem:[#allocation11 + $0x2b0] sm:$0xff]  ;;  %v522_v42 = vld [vmem:[#allocation11 + $0x2c8] sm:$0xff]  ;;  %v1125_v43 = vpack.c.bf16 %v485_v35, %v482_v34 }
  0x76   :  { %1234 = vmatprep.subr.bf16.mxu1 %v1233_v13  ;;  %v481_v44 = vld [vmem:[#allocation11 + $0x180] sm:$0xff]  ;;  %v484_v45 = vld [vmem:[#allocation11 + $0x198] sm:$0xff]  ;;  %v491_v47 = vld [vmem:[#allocation11 + $0x1d0] sm:$0xff]  ;;  %v1243_v48 = vpack.c.bf16 %v468_v39, %v465_v38  ;;  %v1245_v49 = vpack.c.bf16 %v522_v42, %v519_v41  ;;  %v405_v42 = vlaneseq }
  0x77   :  { %1112 = vmatpush1.bf16.msra.mxu0 %v1111_v1  ;;  %v488_v46 = vld [vmem:[#allocation11 + $0x1b8] sm:$0xff]  ;;  %v471_v50 = vld [vmem:[#allocation11 + $0x130] sm:$0xff]  ;;  %v474_v51 = vld [vmem:[#allocation11 + $0x148] sm:$0xff]  ;;  %v1127_v52 = vpack.c.bf16 %v484_v45, %v481_v44 }
  0x78   :  { %1114 = vmatprep.subr.bf16.mxu0 %v1113_v5  ;;  %v1129_v53 = vpack.c.bf16 %v491_v47, %v488_v46  ;;  %v487_v54 = vld [vmem:[#allocation11 + $0x1b0] sm:$0xff]  ;;  %v490_v55 = vld [vmem:[#allocation11 + $0x1c8] sm:$0xff]  ;;  %v497_v57 = vld [vmem:[#allocation11 + $0x200] sm:$0xff]  ;;  %v1247_v58 = vpack.c.bf16 %v474_v51, %v471_v50 }
  0x79   :  { %1236 = vmatpush3.bf16.msra.mxu1 %v1235_v24  ;;  %v494_v56 = vld [vmem:[#allocation11 + $0x1e8] sm:$0xff]  ;;  %v1131_v59 = vpack.c.bf16 %v490_v55, %v487_v54  ;;  %v493_v61 = vld [vmem:[#allocation11 + $0x1e0] sm:$0xff]  ;;  %v496_v62 = vld [vmem:[#allocation11 + $0x1f8] sm:$0xff] }
  0x7a   :  { %1238 = vmatprep.subr.bf16.mxu1 %v1237_v25  ;;  %v1133_v60 = vpack.c.bf16 %v497_v57, %v494_v56  ;;  %v500_v63 = vld [vmem:[#allocation11 + $0x218] sm:$0xff]  ;;  %v503_v0 = vld [vmem:[#allocation11 + $0x230] sm:$0xff]  ;;  %v1135_v1 = vpack.c.bf16 %v496_v62, %v493_v61  ;;  %v502_v4 = vld [vmem:[#allocation11 + $0x228] sm:$0xff] }
  0x7b   :  { %1116 = vmatpush1.bf16.msra.mxu0 %v1115_v16  ;;  %v1137_v2 = vpack.c.bf16 %v503_v0, %v500_v63  ;;  %v499_v3 = vld [vmem:[#allocation11 + $0x210] sm:$0xff]  ;;  %v506_v5 = vld [vmem:[#allocation11 + $0x248] sm:$0xff]  ;;  %v509_v6 = vld [vmem:[#allocation11 + $0x260] sm:$0xff] }
  0x7c   :  { %1118 = vmatprep.subr.bf16.mxu0 %v1117_v18  ;;  %v1139_v7 = vpack.c.bf16 %v502_v4, %v499_v3  ;;  %v1141_v8 = vpack.c.bf16 %v509_v6, %v506_v5  ;;  %v505_v9 = vld [vmem:[#allocation11 + $0x240] sm:$0xff]  ;;  %v508_v10 = vld [vmem:[#allocation11 + $0x258] sm:$0xff]  ;;  %v515_v12 = vld [vmem:[#allocation11 + $0x290] sm:$0xff] }
  0x7d   :  { %1240 = vmatpush3.bf16.msra.mxu1 %v1239_v36  ;;  %v512_v11 = vld [vmem:[#allocation11 + $0x278] sm:$0xff]  ;;  %v1143_v13 = vpack.c.bf16 %v508_v10, %v505_v9  ;;  %v511_v15 = vld [vmem:[#allocation11 + $0x270] sm:$0xff]  ;;  %v514_v16 = vld [vmem:[#allocation11 + $0x288] sm:$0xff] }
  0x7e   :  { %1242 = vmatprep.subr.bf16.mxu1 %v1241_v37  ;;  %v1145_v14 = vpack.c.bf16 %v515_v12, %v512_v11  ;;  %v518_v17 = vld [vmem:[#allocation11 + $0x2a8] sm:$0xff]  ;;  %v521_v18 = vld [vmem:[#allocation11 + $0x2c0] sm:$0xff]  ;;  %v1147_v19 = vpack.c.bf16 %v514_v16, %v511_v15  ;;  %v520_v22 = vld [vmem:[#allocation11 + $0x2b8] sm:$0xff] }
  0x7f   :  { %1120 = vmatpush1.bf16.msra.mxu0 %v1119_v28  ;;  %v1149_v20 = vpack.c.bf16 %v521_v18, %v518_v17  ;;  %v517_v21 = vld [vmem:[#allocation11 + $0x2a0] sm:$0xff]  ;;  %v524_v24 = vld [vmem:[#allocation11 + $0x2d8] sm:$0xff]  ;;  %v527_v25 = vld [vmem:[#allocation11 + $0x2f0] sm:$0xff] }
  0x80   :  { %1122 = vmatprep.subr.bf16.mxu0 %v1121_v31  ;;  %v1151_v23 = vpack.c.bf16 %v520_v22, %v517_v21  ;;  %v525_v26 = vld [vmem:[#allocation11 + $0x2e0] sm:$0xff]  ;;  %v1153_v27 = vpack.c.bf16 %v527_v25, %v524_v24  ;;  %v528_v28 = vld [vmem:[#allocation11 + $0x2f8] sm:$0xff]  ;;  %v523_v29 = vld [vmem:[#allocation11 + $0x2d0] sm:$0xff] }
  0x81   :  { %1244 = vmatpush3.bf16.msra.mxu1 %v1243_v48  ;;  %v526_v30 = vld [vmem:[#allocation11 + $0x2e8] sm:$0xff]  ;;  %v1249_v31 = vpack.c.bf16 %v528_v28, %v525_v26  ;;  %v477_v33 = vld [vmem:[#allocation11 + $0x160] sm:$0xff]  ;;  %v480_v34 = vld [vmem:[#allocation11 + $0x178] sm:$0xff] }
  0x82   :  { %1246 = vmatprep.subr.bf16.mxu1 %v1245_v49  ;;  %v1155_v32 = vpack.c.bf16 %v526_v30, %v523_v29  ;;  %v1251_v35 = vpack.c.bf16 %v480_v34, %v477_v33  ;;  %v530_v36 = vld [vmem:[#allocation11 + $0x308] sm:$0xff]  ;;  %v533_v37 = vld [vmem:[#allocation11 + $0x320] sm:$0xff]  ;;  %v579_v38 = vld [vmem:[#allocation11 + $0x490] sm:$0xff] }
  0x83   :  { %1124 = vmatpush1.bf16.msra.mxu0 %v1123_v40  ;;  %v1157_v39 = vpack.c.bf16 %v533_v37, %v530_v36  ;;  %v582_v40 = vld [vmem:[#allocation11 + $0x4a8] sm:$0xff]  ;;  %v529_v51 = vld [vmem:[#allocation11 + $0x300] sm:$0xff]  ;;  %v531_v55 = vld [vmem:[#allocation11 + $0x310] sm:$0xff] }
  0x84   :  { %1126 = vmatprep.subr.bf16.mxu0 %v1125_v43  ;;  %v1253_v41 = vpack.c.bf16 %v582_v40, %v579_v38  ;;  %v1579_v43 = vshrl.u32 %v405_v42, 7  ;;  %v1587_v45 = vld [vmem:[%s1637_s4] sm:$0xf]  ;;  %v536_v57 = vld [vmem:[#allocation11 + $0x338] sm:$0xff]  ;;  %v585_v61 = vld [vmem:[#allocation11 + $0x4c0] sm:$0xff] }
  0x85   :  { %1248 = vmatpush3.bf16.msra.mxu1 %v1247_v58  ;;  %v534_v56 = vld [vmem:[#allocation11 + $0x328] sm:$0xff]  ;;  %v588_v62 = vld [vmem:[#allocation11 + $0x4d8] sm:$0xff]  ;;  %v535_v3 = vld [vmem:[#allocation11 + $0x330] sm:$0xff] }
  0x86   :  { %1250 = vmatprep.subr.bf16.mxu1 %v1249_v31  ;;  %v1582_v44 = vsub.s32 0, %v1579_v43  ;;  %v1590_v46 = vsub.s32 1, %v1579_v43  ;;  %v419_v49 = vsub.s32 3, %v1579_v43  ;;  %v538_v4 = vld [vmem:[#allocation11 + $0x348] sm:$0xff]  ;;  %v537_v9 = vld [vmem:[#allocation11 + $0x340] sm:$0xff]  ;;  %v540_v10 = vld [vmem:[#allocation11 + $0x358] sm:$0xff] }
  0x87   :  { %1128 = vmatpush1.bf16.msra.mxu0 %v1127_v52  ;;  %v532_v52 = vld [vmem:[#allocation11 + $0x318] sm:$0xff]  ;;  %v542_v11 = vld [vmem:[#allocation11 + $0x368] sm:$0xff]  ;;  %v1163_v17 = vpack.c.bf16 %v538_v4, %v535_v3  ;;  %v1259_v18 = vpack.c.bf16 %v540_v10, %v537_v9  ;;  %v551_v26 = vld [vmem:[#allocation11 + $0x3b0] sm:$0xff]  ;;  %v1601_v10 = vsub.s32 2, %v1579_v43 }
  0x88   :  { %1130 = vmatprep.subr.bf16.mxu0 %v1129_v53  ;;  %v408_v47 = vrot.slane %v1587_v45, %v1582_v44  ;;  %v412_v48 = vrot.slane %v1587_v45, %v1590_v46  ;;  %v594_v15 = vld [vmem:[#allocation11 + $0x508] sm:$0xff]  ;;  %v548_v25 = vld [vmem:[#allocation11 + $0x398] sm:$0xff]  ;;  %v547_v31 = vld [vmem:[#allocation11 + $0x390] sm:$0xff] }
  0x89   :  { %1252 = vmatpush3.bf16.msra.mxu1 %v1251_v35  ;;  %v546_v24 = vld [vmem:[#allocation11 + $0x388] sm:$0xff]  ;;  %v600_v28 = vld [vmem:[#allocation11 + $0x538] sm:$0xff]  ;;  %v1169_v33 = vpack.c.bf16 %v551_v26, %v548_v25  ;;  %v549_v35 = vld [vmem:[#allocation11 + $0x3a0] sm:$0xff] }
  0x8a   :  { %1254 = vmatprep.subr.bf16.mxu1 %v1253_v41  ;;  %v552_v36 = vld [vmem:[#allocation11 + $0x3b8] sm:$0xff]  ;;  %v554_v37 = vld [vmem:[#allocation11 + $0x3c8] sm:$0xff]  ;;  %v557_v38 = vld [vmem:[#allocation11 + $0x3e0] sm:$0xff] }
  0x8b   :  { %1132 = vmatpush1.bf16.msra.mxu0 %v1131_v59  ;;  %v420_v59 = vrot.slane %v1587_v45, %v419_v49  ;;  %v606_v40 = vld [vmem:[#allocation11 + $0x568] sm:$0xff]  ;;  %v1267_v42 = vpack.c.bf16 %v552_v36, %v549_v35  ;;  %v1173_v49 = vpack.c.bf16 %v557_v38, %v554_v37  ;;  %v569_v3 = vld [vmem:[#allocation11 + $0x440] sm:$0xff]  ;;  %v615_v4 = vld [vmem:[#allocation11 + $0x5b0] sm:$0xff] }
  0x8c   :  { %1134 = vmatprep.subr.bf16.mxu0 %v1133_v60  ;;  %v539_v60 = vld [vmem:[#allocation11 + $0x350] sm:$0xff]  ;;  %v568_v9 = vld [vmem:[#allocation11 + $0x438] sm:$0xff]  ;;  %v573_v25 = vld [vmem:[#allocation11 + $0x460] sm:$0xff] }
  0x8d   :  { %v576_v26 = vld [vmem:[#allocation11 + $0x478] sm:$0xff]  ;;  %v587_v35 = vld [vmem:[#allocation11 + $0x4d0] sm:$0xff] }
  0x8f   :  { %1136 = vmatpush1.bf16.msra.mxu0 %v1135_v1  ;;  %v1159_v1 = vpack.c.bf16 %v532_v52, %v529_v51  ;;  %v555_v51 = vld [vmem:[#allocation11 + $0x3d0] sm:$0xff]  ;;  %v558_v52 = vld [vmem:[#allocation11 + $0x3e8] sm:$0xff] }
  0x90   :  { %1138 = vmatprep.subr.bf16.mxu0 %v1137_v2  ;;  %v1255_v2 = vpack.c.bf16 %v534_v56, %v531_v55  ;;  %v609_v55 = vld [vmem:[#allocation11 + $0x580] sm:$0xff]  ;;  %v612_v56 = vld [vmem:[#allocation11 + $0x598] sm:$0xff] }
  0x93   :  { %1140 = vmatpush1.bf16.msra.mxu0 %v1139_v7  ;;  %v1161_v7 = vpack.c.bf16 %v539_v60, %v536_v57  ;;  %v562_v60 = vld [vmem:[#allocation11 + $0x408] sm:$0xff] }
  0x94   :  { %1142 = vmatprep.subr.bf16.mxu0 %v1141_v8  ;;  %v1257_v8 = vpack.c.bf16 %v588_v62, %v585_v61  ;;  %v1273_v62 = vpack.c.bf16 %v612_v56, %v609_v55  ;;  %v598_v55 = vld [vmem:[#allocation11 + $0x528] sm:$0xff] }
  0x95   :  { %v602_v56 = vld [vmem:[#allocation11 + $0x548] sm:$0xff] }
  0x97   :  { %1144 = vmatpush1.bf16.msra.mxu0 %v1143_v13  ;;  %v545_v13 = vld [vmem:[#allocation11 + $0x380] sm:$0xff] }
  0x98   :  { %1146 = vmatprep.subr.bf16.mxu0 %v1145_v14  ;;  %v591_v14 = vld [vmem:[#allocation11 + $0x4f0] sm:$0xff]  ;;  %v1165_v21 = vpack.c.bf16 %v545_v13, %v542_v11 }
  0x99   :  { %v1261_v22 = vpack.c.bf16 %v594_v15, %v591_v14  ;;  %v567_v13 = vld [vmem:[#allocation11 + $0x430] sm:$0xff]  ;;  %v570_v14 = vld [vmem:[#allocation11 + $0x448] sm:$0xff]  ;;  %v572_v15 = vld [vmem:[#allocation11 + $0x458] sm:$0xff] }
  0x9b   :  { %1148 = vmatpush1.bf16.msra.mxu0 %v1147_v19  ;;  %v541_v19 = vld [vmem:[#allocation11 + $0x360] sm:$0xff] }
  0x9c   :  { %1150 = vmatprep.subr.bf16.mxu0 %v1149_v20  ;;  %v544_v20 = vld [vmem:[#allocation11 + $0x378] sm:$0xff] }
  0x9d   :  { %v1167_v29 = vpack.c.bf16 %v544_v20, %v541_v19  ;;  %v1279_v20 = vpack.c.bf16 %v570_v14, %v567_v13  ;;  %v623_v13 = vld [vmem:[#allocation11 + $0x5f0] sm:$0xff] }
  0x9f   :  { %1152 = vmatpush1.bf16.msra.mxu0 %v1151_v23  ;;  %v543_v23 = vld [vmem:[#allocation11 + $0x370] sm:$0xff] }
  0xa0   :  { %1154 = vmatprep.subr.bf16.mxu0 %v1153_v27  ;;  %v597_v27 = vld [vmem:[#allocation11 + $0x520] sm:$0xff]  ;;  %v1263_v30 = vpack.c.bf16 %v546_v24, %v543_v23  ;;  %v574_v24 = vld [vmem:[#allocation11 + $0x468] sm:$0xff] }
  0xa1   :  { %v1265_v34 = vpack.c.bf16 %v600_v28, %v597_v27  ;;  %v578_v27 = vld [vmem:[#allocation11 + $0x488] sm:$0xff]  ;;  %v581_v28 = vld [vmem:[#allocation11 + $0x4a0] sm:$0xff] }
  0xa3   :  { %1156 = vmatpush1.bf16.msra.mxu0 %v1155_v32  ;;  %v550_v32 = vld [vmem:[#allocation11 + $0x3a8] sm:$0xff] }
  0xa4   :  { %1158 = vmatprep.subr.bf16.mxu0 %v1157_v39  ;;  %v603_v39 = vld [vmem:[#allocation11 + $0x550] sm:$0xff]  ;;  %v1171_v41 = vpack.c.bf16 %v550_v32, %v547_v31  ;;  %v1189_v32 = vpack.c.bf16 %v581_v28, %v578_v27 }
 0x13b   :  { %v327_v50 = vpop.f32.mrb[0].mxu1 }
 0x13c   :  { %v425_v53 = vadd.f32 %v408_v47, %v327_v50  ;;  %v329_v54 = vpop.f32.mrb[1].mxu1  ;;  %v553_v47 = vld [vmem:[#allocation11 + $0x3c0] sm:$0xff]  ;;  %v1269_v50 = vpack.c.bf16 %v606_v40, %v603_v39  ;;  %v583_v39 = vld [vmem:[#allocation11 + $0x4b0] sm:$0xff]  ;;  %v586_v40 = vld [vmem:[#allocation11 + $0x4c8] sm:$0xff] }
 0x13d   :  { %v426_v58 = vadd.f32 %v412_v48, %v329_v54  ;;  %v556_v48 = vld [vmem:[#allocation11 + $0x3d8] sm:$0xff]  ;;  %v563_v54 = vld [vmem:[#allocation11 + $0x410] sm:$0xff] }
 0x13e   :  { %v429_v5 = vmax.f32 %v425_v53, 0.0  ;;  %v560_v53 = vld [vmem:[#allocation11 + $0x3f8] sm:$0xff]  ;;  %v1175_v57 = vpack.c.bf16 %v556_v48, %v553_v47  ;;  %v589_v48 = vld [vmem:[#allocation11 + $0x4e0] sm:$0xff] }
 0x13f   :  { %v430_v63 = vmax.f32 %v426_v58, 0.0  ;;  %v1598_v0 = vpop.f32.mrb[2].mxu1  ;;  %v1271_v58 = vpack.c.bf16 %v558_v52, %v555_v51  ;;  %v1177_v61 = vpack.c.bf16 %v563_v54, %v560_v53  ;;  %v599_v51 = vld [vmem:[#allocation11 + $0x530] sm:$0xff] }
 0x140   :  { %v400_v6 = vpop.f32.mrb[3].mxu1  ;;  %v595_v54 = vld [vmem:[#allocation11 + $0x510] sm:$0xff] }
 0x141   :  { %v428_v12 = vadd.f32 %v420_v59, %v400_v6  ;;  %706 = vmatprep.mubr.f32.mxu0 %v430_v63  ;;  %848 = vmatprep.mubr.f32.mxu1 %v430_v63  ;;  %v559_v59 = vld [vmem:[#allocation11 + $0x3f0] sm:$0xff]  ;;  %v561_v63 = vld [vmem:[#allocation11 + $0x400] sm:$0xff] }
 0x142   :  { %707 = vmatmul.mubr.f32.vlgmr.msra.gmra.mrb[0].mxu0 %v429_v5  ;;  %849 = vmatmul.mubr.f32.vlgmr.msra.gmra.mrb[4].mxu1 %v429_v5  ;;  %v618_v5 = vld [vmem:[#allocation11 + $0x5c8] sm:$0xff]  ;;  %v1179_v6 = vpack.c.bf16 %v562_v60, %v559_v59  ;;  %v601_v60 = vld [vmem:[#allocation11 + $0x540] sm:$0xff] }
 0x143   :  { %v432_v16 = vmax.f32 %v428_v12, 0.0  ;;  %1160 = vmatpush1.bf16.msra.mxu0 %v1159_v1  ;;  %1256 = vmatpush3.bf16.msra.mxu1 %v1255_v2  ;;  %v564_v1 = vld [vmem:[#allocation11 + $0x418] sm:$0xff]  ;;  %v566_v2 = vld [vmem:[#allocation11 + $0x428] sm:$0xff]  ;;  %v1277_v12 = vpack.c.bf16 %v618_v5, %v615_v4 }
 0x144   :  { %1162 = vmatprep.subr.bf16.mxu0 %v1161_v7  ;;  %1258 = vmatprep.subr.bf16.mxu1 %v1257_v8  ;;  %v1275_v7 = vpack.c.bf16 %v564_v1, %v561_v63  ;;  %v565_v8 = vld [vmem:[#allocation11 + $0x420] sm:$0xff]  ;;  %v1181_v11 = vpack.c.bf16 %v569_v3, %v566_v2  ;;  %v611_v63 = vld [vmem:[#allocation11 + $0x590] sm:$0xff]  ;;  %v610_v4 = vld [vmem:[#allocation11 + $0x588] sm:$0xff] }
 0x145   :  { %777 = vmatprep.mubr.f32.mxu0 %v432_v16  ;;  %918 = vmatprep.mubr.f32.mxu1 %v432_v16  ;;  %v575_v16 = vld [vmem:[#allocation11 + $0x470] sm:$0xff]  ;;  %v1183_v19 = vpack.c.bf16 %v568_v9, %v565_v8  ;;  %v614_v5 = vld [vmem:[#allocation11 + $0x5a8] sm:$0xff]  ;;  %v613_v9 = vld [vmem:[#allocation11 + $0x5a0] sm:$0xff] }
 0x146   :  { %v1185_v43 = vpack.c.bf16 %v575_v16, %v572_v15  ;;  %v607_v3 = vld [vmem:[#allocation11 + $0x570] sm:$0xff] }
 0x147   :  { %1164 = vmatpush1.bf16.msra.mxu0 %v1163_v17  ;;  %1260 = vmatpush3.bf16.msra.mxu1 %v1259_v18  ;;  %v621_v17 = vld [vmem:[#allocation11 + $0x5e0] sm:$0xff]  ;;  %v624_v18 = vld [vmem:[#allocation11 + $0x5f8] sm:$0xff]  ;;  %v619_v16 = vld [vmem:[#allocation11 + $0x5d0] sm:$0xff] }
 0x148   :  { %1166 = vmatprep.subr.bf16.mxu0 %v1165_v21  ;;  %1262 = vmatprep.subr.bf16.mxu1 %v1261_v22  ;;  %v571_v21 = vld [vmem:[#allocation11 + $0x450] sm:$0xff]  ;;  %v416_v22 = vrot.slane %v1587_v45, %v1601_v10  ;;  %v1281_v23 = vpack.c.bf16 %v624_v18, %v621_v17  ;;  %v577_v45 = vld [vmem:[#allocation11 + $0x480] sm:$0xff]  ;;  %v622_v17 = vld [vmem:[#allocation11 + $0x5e8] sm:$0xff] }
 0x149   :  { %v1219_v18 = vpack.c.bf16 %v622_v17, %v619_v16 }
 0x14a   :  { %v1606_v31 = vadd.f32 %v416_v22, %v1598_v0  ;;  %v1195_v0 = vpack.c.bf16 %v586_v40, %v583_v39  ;;  %v625_v22 = vld [vmem:[%s1639_s6] sm:$0x7]  ;;  %s1454_s6 = smov [#allocation12]  }
 0x14b   :  { %1168 = vmatpush1.bf16.msra.mxu0 %v1167_v29  ;;  %1264 = vmatpush3.bf16.msra.mxu1 %v1263_v30  ;;  %v1187_v29 = vpack.c.bf16 %v574_v24, %v571_v21  ;;  %v1283_v30 = vpack.c.bf16 %v576_v26, %v573_v25  ;;  %v630_v28 = vrot.slane %v625_v22, %v1582_v44 }
 0x14c   :  { %1170 = vmatprep.subr.bf16.mxu0 %v1169_v33  ;;  %1266 = vmatprep.subr.bf16.mxu1 %v1265_v34  ;;  %v580_v33 = vld [vmem:[#allocation11 + $0x498] sm:$0xff]  ;;  %v431_v37 = vmax.f32 %v1606_v31, 0.0  ;;  %v927_v31 = vld [vmem:[%s1640_s7] sm:$0x7]  ;;  %s999_s7 = sshll.u32 %s1454_s6, 4  ;;  %s1000_s7 = int_to_ptr.vmem [resolvable:$true] %s999_s7 }
 0x14d   :  { %v584_v34 = vld [vmem:[#allocation11 + $0x4b8] sm:$0xff]  ;;  %v1191_v36 = vpack.c.bf16 %v580_v33, %v577_v45  ;;  %v932_v45 = vrot.slane %v927_v31, %v1582_v44  ;;  %v940_v39 = vrot.slane %v927_v31, %v1601_v10  ;;  %s1414_s28 = scalar_lea.vmem %s1000_s7, 16  ;;  %s1418_s29 = scalar_lea.vmem %s1000_s7, 32 }
 0x14e   :  { %v1193_v38 = vpack.c.bf16 %v587_v35, %v584_v34  ;;  %v936_v35 = vrot.slane %v927_v31, %v1590_v46  ;;  %p1415_p12 = scmp.ne.s32.totalorder %s1000_s7, %s1414_s28  ;;  %p1419_p13 = scmp.lt.s32.totalorder %s1000_s7, %s1000_s7 }
 0x14f   :  { %1172 = vmatpush1.bf16.msra.mxu0 %v1171_v41  ;;  %1268 = vmatpush3.bf16.msra.mxu1 %v1267_v42  ;;  %v590_v41 = vld [vmem:[#allocation11 + $0x4e8] sm:$0xff]  ;;  %v593_v42 = vld [vmem:[#allocation11 + $0x500] sm:$0xff]  ;;  %p1420_p0 = scmp.lt.s32.totalorder %s1418_s29, %s1414_s28 }
 0x150   :  { %1174 = vmatprep.subr.bf16.mxu0 %v1173_v49  ;;  %1270 = vmatprep.subr.bf16.mxu1 %v1269_v50  ;;  %v1197_v47 = vpack.c.bf16 %v593_v42, %v590_v41  ;;  %v592_v49 = vld [vmem:[#allocation11 + $0x4f8] sm:$0xff] }
 0x151   :  { %v596_v50 = vld [vmem:[#allocation11 + $0x518] sm:$0xff]  ;;  %v1199_v52 = vpack.c.bf16 %v592_v49, %v589_v48  ;;  %v1014_v48 = vld [vmem:[#allocation2] ss:$0 sm:$0xff]  ;;  %p1421_p1 = por %p1420_p0, %p1419_p13 }
 0x152   :  { %v1201_v53 = vpack.c.bf16 %v599_v51, %v596_v50 }
 0x153   :  { %1176 = vmatpush1.bf16.msra.mxu0 %v1175_v57  ;;  %1272 = vmatpush3.bf16.msra.mxu1 %v1271_v58  ;;  %v605_v57 = vld [vmem:[#allocation11 + $0x560] sm:$0xff]  ;;  %v1203_v58 = vpack.c.bf16 %v598_v55, %v595_v54  ;;  %p1422_p2 = pnand %p1421_p1, %p1415_p12 }
 0x154   :  { %1178 = vmatprep.subr.bf16.mxu0 %v1177_v61  ;;  %1274 = vmatprep.subr.bf16.mxu1 %v1273_v62  ;;  %v1205_v59 = vpack.c.bf16 %v605_v57, %v602_v56  ;;  %v604_v61 = vld [vmem:[#allocation11 + $0x558] sm:$0xff] }
 0x155   :  { %v608_v62 = vld [vmem:[#allocation11 + $0x578] sm:$0xff]  ;;  %v1207_v1 = vpack.c.bf16 %v604_v61, %v601_v60 }
 0x156   :  { %v1209_v2 = vpack.c.bf16 %v611_v63, %v608_v62 }
 0x157   :  { %1180 = vmatpush1.bf16.msra.mxu0 %v1179_v6  ;;  %1276 = vmatpush3.bf16.msra.mxu1 %v1275_v7  ;;  %v617_v6 = vld [vmem:[#allocation11 + $0x5c0] sm:$0xff]  ;;  %v1211_v7 = vpack.c.bf16 %v610_v4, %v607_v3 }
 0x158   :  { %1182 = vmatprep.subr.bf16.mxu0 %v1181_v11  ;;  %1278 = vmatprep.subr.bf16.mxu1 %v1277_v12  ;;  %v1213_v8 = vpack.c.bf16 %v617_v6, %v614_v5  ;;  %v616_v11 = vld [vmem:[#allocation11 + $0x5b8] sm:$0xff] }
 0x159   :  { %v620_v12 = vld [vmem:[#allocation11 + $0x5d8] sm:$0xff]  ;;  %v1215_v14 = vpack.c.bf16 %v616_v11, %v613_v9 }
 0x15a   :  { %v1217_v15 = vpack.c.bf16 %v623_v13, %v620_v12 }
 0x15b   :  { %1184 = vmatpush1.bf16.msra.mxu0 %v1183_v19  ;;  %1280 = vmatpush3.bf16.msra.mxu1 %v1279_v20 }
 0x15c   :  { %1186 = vmatprep.subr.bf16.mxu0 %v1185_v43  ;;  %1282 = vmatprep.subr.bf16.mxu1 %v1281_v23  ;;  %v638_v43 = vrot.slane %v625_v22, %v1601_v10 }
 0x15f   :  { %1188 = vmatpush1.bf16.msra.mxu0 %v1187_v29  ;;  %1284 = vmatpush3.bf16.msra.mxu1 %v1283_v30  ;;  %v634_v29 = vrot.slane %v625_v22, %v1590_v46 }
 0x160   :  { %1190 = vmatprep.subr.bf16.mxu0 %v1189_v32 }
 0x162   :  { %919 = vmatmul.mubr.f32.vlgmr.msra.gmra.mrb[6].mxu1 %v431_v37 }
 0x163   :  { %1192 = vmatpush1.bf16.msra.mxu0 %v1191_v36 }
 0x164   :  { %1194 = vmatprep.subr.bf16.mxu0 %v1193_v38 }
 0x167   :  { %1196 = vmatpush1.bf16.msra.mxu0 %v1195_v0 }
 0x168   :  { %1198 = vmatprep.subr.bf16.mxu0 %v1197_v47 }
 0x16b   :  { %1200 = vmatpush1.bf16.msra.mxu0 %v1199_v52 }
 0x16c   :  { %1202 = vmatprep.subr.bf16.mxu0 %v1201_v53 }
 0x16f   :  { %1204 = vmatpush1.bf16.msra.mxu0 %v1203_v58 }
 0x170   :  { %1206 = vmatprep.subr.bf16.mxu0 %v1205_v59 }
 0x173   :  { %1208 = vmatpush1.bf16.msra.mxu0 %v1207_v1 }
 0x174   :  { %1210 = vmatprep.subr.bf16.mxu0 %v1209_v2 }
 0x177   :  { %1212 = vmatpush1.bf16.msra.mxu0 %v1211_v7 }
 0x178   :  { %1214 = vmatprep.subr.bf16.mxu0 %v1213_v8 }
 0x17b   :  { %1216 = vmatpush1.bf16.msra.mxu0 %v1215_v14 }
 0x17c   :  { %1218 = vmatprep.subr.bf16.mxu0 %v1217_v15 }
 0x17f   :  { %1220 = vmatpush1.bf16.msra.mxu0 %v1219_v18 }
 0x182   :  { %778 = vmatmul.mubr.f32.vlgmr.msra.gmra.mrb[0].mxu0 %v431_v37 }
 0x215   :  { %v1047_v19 = vpop.f32.mrb[4].mxu1 }
 0x216   :  { %v1048_v20 = vpop.f32.mrb[5].mxu1 }
 0x217   :  { %v1049_v21 = vadd.f32 %v1048_v20, %v1047_v19 }
 0x219   :  { %v851_v25 = vadd.f32 %v1049_v21, %v638_v43 }
 0x235   :  { %v1082_v23 = vpop.f32.mrb[6].mxu1 }
 0x236   :  { %v1083_v24 = vpop.f32.mrb[7].mxu1 }
 0x237   :  { %v1084_v26 = vadd.f32 %v1083_v24, %v1082_v23 }
 0x239   :  { %v921_v27 = vadd.f32 %v1084_v26, %v851_v25 }
 0x23b   :  { %v926_v37 = vmax.f32 %v921_v27, 0.0 }
 0x23d   :  { %v946_v42 = vmul.f32 %v940_v39, %v926_v37 }
 0x255   :  { %v779_v30 = vpop.f32.mrb[0].mxu0 }
 0x256   :  { %v1285_v32 = vadd.f32 %v779_v30, %v630_v28  ;;  %v781_v33 = vpop.f32.mrb[1].mxu0 }
 0x257   :  { %v1286_v34 = vadd.f32 %v781_v33, %v634_v29 }
 0x258   :  { %v924_v36 = vmax.f32 %v1285_v32, 0.0 }
 0x259   :  { %v925_v38 = vmax.f32 %v1286_v34, 0.0 }
 0x25a   :  { %v944_v40 = vmul.f32 %v932_v45, %v924_v36 }
 0x25b   :  { %v945_v41 = vmul.f32 %v936_v35, %v925_v38 }
 0x25d   :  { %v947_v0 = vadd.f32 %v945_v41, %v944_v40 }
 0x25f   :  { %v948_v47 = vadd.f32 %v947_v0, %v946_v42 }
 0x261   :  { %949 = vadd.xlane.f32.xlu0 %v948_v47 }
 0x2ee   :  { %v950_v49 = vpop.xlane.xlu0 %949 }
 0x2ef   :  { %v958_v50 = vadd.f32 %v1014_v48, %v950_v49 }
 0x2f1   :  { %959 = vxpose.xlu0.b32.start.end [1/1] (short) (narrow) %v958_v50, 8 }
 0x371   :  { %v975_v44 = vpop.trf.xlu0 }
 0x372   :  { %992 = vst.msk [vmem:[#allocation12] sm:$0x1] %vm991_vm2, %v975_v44 }
 0x373   :  { %1425 = shalt.err (!%p1422_p2)
}
 0x374   :  { %s1426_s0 = scalar_lea.hbm %s1642_s9, 16 }
 0x375   :  { %p1427_p3 = scmp.ne.s32.totalorder %s1642_s9, %s1426_s0  ;;  %p1430_p4 = scmp.lt.u32.totalorder %s1426_s0, %s1642_s9 }
 0x377   :  { %p1432_p5 = pnand %p1430_p4, %p1427_p3 }
 0x379   :  { %1435 = shalt.err (!%p1432_p5)
}
 0x37a   :  { %1002 = dma.vmem_to_hbm [thread:$0]  %s1000_s7, 16, %s1642_s9, [#allocation5]  }
 0x37b   :  { %1442 = dma.done.wait [#allocation5], 16  }
 0x37c   :  { %1443 = vsyncadd [#allocation5], 4294967280 }
 0x37d   :  { %1006 = vsyncpa [#allocation4], 1 }
 0x37e   :  { %1007 = vsyncpa [#allocation7], 1 }
 0x37f   :  { %1008 = vsyncpa [#allocation10], 1 }
 0x380   :  { %1009 = vsyncpa [#allocation5], 1 }

</bundles_post_ra>
